<compile_context>
chip_gen: v7x
topology: tpu7x:2x2x1
jax: 0.10.0
libtpu: 0.0.40
codegen_flags: <defaults>
</compile_context>

<pallas_src>
import functools

import jax
import jax.numpy as jnp
from jax.experimental import pallas as pl
from jax.experimental.pallas import tpu as pltpu

LANE = 128
VMEM_LIMIT_BYTES = 32 * 1024 * 1024  # explicit scoped-VMEM limit (v5e default is only 16 MiB)


# ---------------------------------------------------------------------------
# Padding / tiling helpers (pure glue)
# ---------------------------------------------------------------------------
def _round_up(n, m):
    return ((n + m - 1) // m) * m


def _choose_tile(n, pref):
    """Pick a tile (multiple of 128, capped at `pref`) and the padded extent."""
    tile = min(pref, _round_up(max(n, 1), LANE))
    padded = _round_up(max(n, 1), tile)
    return tile, padded


def _prop_row_tiles(total):
    """(tm, tk, padded_total) for the canonical node axis of the propagation.

    Large tiles (tm<=512, tk<=2048) amortize per-grid-step overhead; both tiles
    divide the padded total so M and K index the same canonical axis.
    """
    total = max(total, 1)
    if total <= 512:
        tp = _round_up(total, LANE)
        return tp, tp, tp                     # single tile in both M and K
    tp = _round_up(total, 512)
    tm = 512
    if tp % 2048 == 0:
        tk = 2048
    elif tp % 1024 == 0:
        tk = 1024
    else:
        tk = 512
    return tm, tk, tp


def _pad2d(x, rows, cols):
    r, c = x.shape
    if r == rows and c == cols:
        return x
    return jnp.pad(x, ((0, rows - r), (0, cols - c)))


# ---------------------------------------------------------------------------
# Pallas kernels
# ---------------------------------------------------------------------------
def _mlp_kernel(x_ref, *refs, num_layers):
    """Fused Linear->ReLU stack.  refs = (w0, b0, w1, b1, ..., o_ref)."""
    o_ref = refs[-1]
    h = x_ref[...]
    for l in range(num_layers):
        w_ref = refs[2 * l]
        b_ref = refs[2 * l + 1]
        y = jnp.dot(h, w_ref[...], preferred_element_type=jnp.float32)
        y = jnp.maximum(y + b_ref[...].astype(jnp.float32), 0.0)
        h = y.astype(jnp.bfloat16)          # next matmul input stays bf16
    o_ref[...] = h.astype(o_ref.dtype)


def _prop_kernel(h_dst_ref, adj_ref, h_src_ref, o_ref, acc_ref, *, alpha):
    """out = alpha * h_dst + adj_full @ h_all  (K tiled, f32 VMEM accumulator).

    N (= hp) is a single tile, so adj is streamed from HBM exactly once.
    """
    k = pl.program_id(1)

    @pl.when(k == 0)
    def _():
        acc_ref[...] = h_dst_ref[...].astype(jnp.float32) * jnp.float32(alpha)

    acc_ref[...] += jnp.dot(adj_ref[...], h_src_ref[...],
                            preferred_element_type=jnp.float32)

    @pl.when(k == pl.num_programs(1) - 1)
    def _():
        o_ref[...] = acc_ref[...].astype(o_ref.dtype)


def _out_linear_kernel(x_ref, w_ref, b_ref, o_ref):
    """Single-K-tile y = x @ W + b (no accumulator scratch / K grid axis)."""
    y = jnp.dot(x_ref[...], w_ref[...], preferred_element_type=jnp.float32)
    o_ref[...] = (y + b_ref[...].astype(jnp.float32)).astype(o_ref.dtype)


# ---------------------------------------------------------------------------
# pallas_call wrappers
# ---------------------------------------------------------------------------
def mlp_pallas(x, wbs, *, tm):
    """Fused per-node-type input MLP.  Grid over row tiles; weights VMEM-resident."""
    m, f = x.shape
    h_out = wbs[-1][0].shape[1]
    in_specs = [pl.BlockSpec((tm, f), lambda i: (i, 0))]
    args = [x]
    for (w, b) in wbs:
        in_specs.append(pl.BlockSpec(w.shape, lambda i: (0, 0)))
        in_specs.append(pl.BlockSpec(b.shape, lambda i: (0, 0)))
        args.append(w)
        args.append(b)
    return pl.pallas_call(
        functools.partial(_mlp_kernel, num_layers=len(wbs)),
        out_shape=jax.ShapeDtypeStruct((m, h_out), jnp.bfloat16),
        grid_spec=pltpu.PrefetchScalarGridSpec(
            num_scalar_prefetch=0,
            grid=(m // tm,),
            in_specs=in_specs,
            out_specs=pl.BlockSpec((tm, h_out), lambda i: (i, 0)),
        ),
        compiler_params=pltpu.CompilerParams(
            dimension_semantics=("parallel",),
            vmem_limit_bytes=VMEM_LIMIT_BYTES),
    )(*args)


def propagate_pallas(h_all, adj_full, *, alpha, tm, tk):
    """One fused call per SGC layer over the canonical node layout:
       h_new = alpha * h_all + adj_full @ h_all."""
    m, hp = h_all.shape                      # m == padded canonical node count
    grid = (m // tm, m // tk)
    flops = 2 * m * m * hp + m * hp
    # adj read once; h_all (src) re-read per M tile; residual + output once.
    bytes_accessed = 2 * m * m + 2 * (m // tm) * m * hp + 4 * m * hp
    return pl.pallas_call(
        functools.partial(_prop_kernel, alpha=alpha),
        out_shape=jax.ShapeDtypeStruct((m, hp), jnp.bfloat16),
        grid_spec=pltpu.PrefetchScalarGridSpec(
            num_scalar_prefetch=0,
            grid=grid,
            in_specs=[
                pl.BlockSpec((tm, hp), lambda i, k: (i, 0)),   # residual (k==0 init)
                pl.BlockSpec((tm, tk), lambda i, k: (i, k)),   # adjacency tile
                pl.BlockSpec((tk, hp), lambda i, k: (k, 0)),   # source rows tile
            ],
            out_specs=pl.BlockSpec((tm, hp), lambda i, k: (i, 0)),
            scratch_shapes=[pltpu.VMEM((tm, hp), jnp.float32)],
        ),
        compiler_params=pltpu.CompilerParams(
            dimension_semantics=("parallel", "arbitrary"),
            vmem_limit_bytes=VMEM_LIMIT_BYTES),
        cost_estimate=pl.CostEstimate(flops=flops, transcendentals=0,
                                      bytes_accessed=bytes_accessed),
    )(h_all, adj_full, h_all)


def out_linear_pallas(x, w, b, *, tm):
    """Output projection: hp is one tile -> plain y = x @ W + b per row tile."""
    m, hp = x.shape
    op = w.shape[1]
    return pl.pallas_call(
        _out_linear_kernel,
        out_shape=jax.ShapeDtypeStruct((m, op), jnp.float32),
        grid_spec=pltpu.PrefetchScalarGridSpec(
            num_scalar_prefetch=0,
            grid=(m // tm,),
            in_specs=[
                pl.BlockSpec((tm, hp), lambda i: (i, 0)),
                pl.BlockSpec((hp, op), lambda i: (0, 0)),
                pl.BlockSpec((1, op), lambda i: (0, 0)),
            ],
            out_specs=pl.BlockSpec((tm, op), lambda i: (i, 0)),
        ),
        compiler_params=pltpu.CompilerParams(
            dimension_semantics=("parallel",),
            vmem_limit_bytes=VMEM_LIMIT_BYTES),
    )(x, w, b)


# ---------------------------------------------------------------------------
# HeteroSGC forward (mirrors the PyTorch module's forward exactly)
# ---------------------------------------------------------------------------
def hetero_sgc_forward(x_dict, adj_t_dict, params, *, target_node_type,
                       num_layers, alpha):
    bf16 = jnp.bfloat16
    node_types = list(x_dict.keys())

    hidden = params["in_lin"][node_types[0]][0][0].shape[1]
    out_ch = params["out_lin"][0].shape[1]
    hp = _round_up(hidden, LANE)            # lane-dense hidden width (single N tile)
    op = _round_up(out_ch, LANE)

    # Per-node-type row tiles / padded extents for the fused input MLP.
    n_real, tm_mlp, np_rows = {}, {}, {}
    for nt in node_types:
        n_real[nt] = x_dict[nt].shape[0]
        tm_mlp[nt], np_rows[nt] = _choose_tile(n_real[nt], 256)

    # ---- fused per-node-type input MLP (Linear -> ReLU stack) ----
    h_pad = {}
    for nt in node_types:
        x = x_dict[nt]
        fp = _round_up(x.shape[1], LANE)
        xp = _pad2d(x, np_rows[nt], fp).astype(bf16)
        wbs = []
        k_in = fp
        for (w, b) in params["in_lin"][nt]:
            wbs.append((_pad2d(w, k_in, hp).astype(bf16),   # bf16 MXU weights
                        _pad2d(b, 1, hp)))                  # f32 bias (VPU epilogue)
            k_in = hp
        h_pad[nt] = mlp_pallas(xp, wbs, tm=tm_mlp[nt])

    # ---- canonical node layout: all types stacked once, adjacency built once ----
    off, total = {}, 0
    for nt in node_types:
        off[nt] = total
        total += np_rows[nt]
    tm_p, tk_p, total_pad = _prop_row_tiles(total)

    h_all = _pad2d(jnp.concatenate([h_pad[nt] for nt in node_types], axis=0),
                   total_pad, hp)

    # Padded MLP rows hold relu(bias) garbage; their adjacency columns are zero
    # so they only ever accumulate alpha*garbage onto themselves and are sliced
    # off at the end.
    adj_full = jnp.zeros((total_pad, total_pad), dtype=bf16)
    for (src, _, dst), adj in adj_t_dict.items():
        adj_full = jax.lax.dynamic_update_slice(
            adj_full, adj.astype(bf16), (off[dst], off[src]))

    # ---- SGC propagation layers: h = alpha*h + adj_full @ h (one call / layer) ----
    for _ in range(num_layers):
        h_all = propagate_pallas(h_all, adj_full, alpha=alpha, tm=tm_p, tk=tk_p)

    # ---- output projection ----
    tgt = target_node_type
    h_tgt = h_all[off[tgt]:off[tgt] + np_rows[tgt], :]       # static slice
    w_out, b_out = params["out_lin"]
    logits_pad = out_linear_pallas(
        h_tgt, _pad2d(w_out, hp, op).astype(bf16), _pad2d(b_out, 1, op),
        tm=tm_mlp[tgt])
    return logits_pad[:n_real[tgt], :out_ch]


# ---------------------------------------------------------------------------
# Pure-JAX reference (mirrors the kernel's bf16-in / f32-accumulate arithmetic)
# ---------------------------------------------------------------------------
def hetero_sgc_reference(x_dict, adj_t_dict, params, *, target_node_type,
                         num_layers, alpha):
    bf16 = jnp.bfloat16
    h_dict = {}
    for nt, x in x_dict.items():
        h = x.astype(bf16)
        for (w, b) in params["in_lin"][nt]:
            y = jnp.dot(h, w.astype(bf16), preferred_element_type=jnp.float32) + b
            h = jnp.maximum(y, 0.0).astype(bf16)
        h_dict[nt] = h
    for _ in range(num_layers):
        out = {nt: alpha * h.astype(jnp.float32) for nt, h in h_dict.items()}
        for (src, _, dst), adj in adj_t_dict.items():
            out[dst] = out[dst] + jnp.dot(adj.astype(bf16), h_dict[src],
                                          preferred_element_type=jnp.float32)
        h_dict = {nt: v.astype(bf16) for nt, v in out.items()}
    w, b = params["out_lin"]
    return jnp.dot(h_dict[target_node_type], w.astype(bf16),
                   preferred_element_type=jnp.float32) + b


# ---------------------------------------------------------------------------
# Main
# ---------------------------------------------------------------------------
if __name__ == "__main__":
    key = jax.random.PRNGKey(0)

    # Small synthetic hetero graph
    node_types = ["paper", "author"]
    edge_types = [
        ("author", "writes", "paper"),
        ("paper", "written_by", "author"),
        ("paper", "cites", "paper"),
    ]
    target_node_type = "paper"

    num_nodes = {"paper": 32, "author": 16}
    in_feats = {"paper": 24, "author": 16}
    hidden_channels = 32
    out_channels = 8
    num_layers = 2
    num_lins = 2
    alpha = 0.01

    # Deterministic node features
    x_dict = {}
    for nt in node_types:
        key, sub = jax.random.split(key)
        x_dict[nt] = jax.random.normal(
            sub, (num_nodes[nt], in_feats[nt]), dtype=jnp.float32)

    # Deterministic dense adjacency matrices: adj[dst, src] (row-normalized)
    adj_t_dict = {}
    for et in edge_types:
        src, _, dst = et
        key, sub = jax.random.split(key)
        dense = (jax.random.uniform(sub, (num_nodes[dst], num_nodes[src]))
                 < 0.2).astype(jnp.float32)
        deg = jnp.maximum(dense.sum(axis=1, keepdims=True), 1.0)
        adj_t_dict[et] = dense / deg

    # Deterministic parameters (Linear weights + biases)
    params = {"in_lin": {}, "out_lin": None}
    for nt in node_types:
        layers = []
        fan_in = in_feats[nt]
        for _ in range(num_lins):
            key, kw, kb = jax.random.split(key, 3)
            w = jax.random.normal(kw, (fan_in, hidden_channels),
                                  dtype=jnp.float32) * 0.1
            b = jax.random.normal(kb, (1, hidden_channels),
                                  dtype=jnp.float32) * 0.1
            layers.append((w, b))
            fan_in = hidden_channels
        params["in_lin"][nt] = layers
    key, kw, kb = jax.random.split(key, 3)
    params["out_lin"] = (
        jax.random.normal(kw, (hidden_channels, out_channels),
                          dtype=jnp.float32) * 0.1,
        jax.random.normal(kb, (1, out_channels), dtype=jnp.float32) * 0.1,
    )

    logits = hetero_sgc_forward(
        x_dict, adj_t_dict, params,
        target_node_type=target_node_type,
        num_layers=num_layers, alpha=alpha)
    logits = jax.block_until_ready(logits)

    ref = hetero_sgc_reference(
        x_dict, adj_t_dict, params,
        target_node_type=target_node_type,
        num_layers=num_layers, alpha=alpha)

    assert logits.shape == (num_nodes[target_node_type], out_channels)
    assert jnp.allclose(logits, ref, atol=1e-2, rtol=1e-2)
    print("KERNEL_OK")
</pallas_src>

<mosaic_0001>
module attributes {stable_mosaic.version = 11 : i64} {
  func.func @_mlp_kernel(%arg0: i32, %arg1: memref<128x128xbf16, #tpu.memory_space<vmem>>, %arg2: memref<128x128xbf16, #tpu.memory_space<vmem>>, %arg3: memref<1x128xf32, #tpu.memory_space<vmem>>, %arg4: memref<128x128xbf16, #tpu.memory_space<vmem>>, %arg5: memref<1x128xf32, #tpu.memory_space<vmem>>, %arg6: memref<128x128xbf16, #tpu.memory_space<vmem>>) attributes {dimension_semantics = [#tpu.dimension_semantics<parallel>], iteration_bounds = array<i64: 1>, scalar_prefetch = 0 : i64, scratch_operands = 0 : i64, tpu.core_type = #tpu.core_type<tc>, window_params = [{transform_indices = @transform_0, window_bounds = array<i64: 128, 128>}, {pipeline_mode = #tpu.pipeline_mode<synchronous>, transform_indices = @transform_1, window_bounds = array<i64: 128, 128>}, {pipeline_mode = #tpu.pipeline_mode<synchronous>, transform_indices = @transform_2, window_bounds = array<i64: 1, 128>}, {pipeline_mode = #tpu.pipeline_mode<synchronous>, transform_indices = @transform_3, window_bounds = array<i64: 128, 128>}, {pipeline_mode = #tpu.pipeline_mode<synchronous>, transform_indices = @transform_4, window_bounds = array<i64: 1, 128>}, {transform_indices = @transform_5, window_bounds = array<i64: 128, 128>}]} {
    %c0 = arith.constant 0 : index
    %c0_0 = arith.constant 0 : index
    %0 = vector.load %arg1[%c0, %c0_0] : memref<128x128xbf16, #tpu.memory_space<vmem>>, vector<128x128xbf16>
    %c0_1 = arith.constant 0 : index
    %c0_2 = arith.constant 0 : index
    %1 = vector.load %arg2[%c0_1, %c0_2] : memref<128x128xbf16, #tpu.memory_space<vmem>>, vector<128x128xbf16>
    %cst = arith.constant dense<0.000000e+00> : vector<128x128xf32>
    %2 = tpu.matmul %0, %1, %cst {dimension_numbers = #tpu.dot_dimension_numbers<[1], [0], [0], [1], [0, 0, 1, 1], [], []>} : vector<128x128xbf16>, vector<128x128xbf16>, vector<128x128xf32> -> vector<128x128xf32>
    %c0_3 = arith.constant 0 : index
    %c0_4 = arith.constant 0 : index
    %3 = vector.load %arg3[%c0_3, %c0_4] : memref<1x128xf32, #tpu.memory_space<vmem>>, vector<1x128xf32>
    %4 = vector.broadcast %3 : vector<1x128xf32> to vector<128x128xf32>
    %5 = arith.addf %2, %4 : vector<128x128xf32>
    %cst_5 = arith.constant 0.000000e+00 : f32
    %6 = vector.broadcast %cst_5 : f32 to vector<128x128xf32>
    %7 = arith.maximumf %5, %6 : vector<128x128xf32>
    %8 = arith.truncf %7 : vector<128x128xf32> to vector<128x128xbf16>
    %c0_6 = arith.constant 0 : index
    %c0_7 = arith.constant 0 : index
    %9 = vector.load %arg4[%c0_6, %c0_7] : memref<128x128xbf16, #tpu.memory_space<vmem>>, vector<128x128xbf16>
    %cst_8 = arith.constant dense<0.000000e+00> : vector<128x128xf32>
    %10 = tpu.matmul %8, %9, %cst_8 {dimension_numbers = #tpu.dot_dimension_numbers<[1], [0], [0], [1], [0, 0, 1, 1], [], []>} : vector<128x128xbf16>, vector<128x128xbf16>, vector<128x128xf32> -> vector<128x128xf32>
    %c0_9 = arith.constant 0 : index
    %c0_10 = arith.constant 0 : index
    %11 = vector.load %arg5[%c0_9, %c0_10] : memref<1x128xf32, #tpu.memory_space<vmem>>, vector<1x128xf32>
    %12 = vector.broadcast %11 : vector<1x128xf32> to vector<128x128xf32>
    %13 = arith.addf %10, %12 : vector<128x128xf32>
    %cst_11 = arith.constant 0.000000e+00 : f32
    %14 = vector.broadcast %cst_11 : f32 to vector<128x128xf32>
    %15 = arith.maximumf %13, %14 : vector<128x128xf32>
    %16 = arith.truncf %15 : vector<128x128xf32> to vector<128x128xbf16>
    %c0_12 = arith.constant 0 : index
    %c0_13 = arith.constant 0 : index
    %17 = vector.load %arg6[%c0_12, %c0_13] : memref<128x128xbf16, #tpu.memory_space<vmem>>, vector<128x128xbf16>
    tpu.vector_store %arg6[%c0_12, %c0_13], %16 {strides = array<i32>} : memref<128x128xbf16, #tpu.memory_space<vmem>>, vector<128x128xbf16>,
    return
  }
  func.func @transform_0(%arg0: i32) -> (i32, i32) {
    %c0_i32 = arith.constant 0 : i32
    %c0_i32_0 = arith.constant 0 : i32
    return %arg0, %c0_i32 : i32, i32
  }
  func.func @transform_1(%arg0: i32) -> (i32, i32) {
    %c0_i32 = arith.constant 0 : i32
    %c0_i32_0 = arith.constant 0 : i32
    %c0_i32_1 = arith.constant 0 : i32
    return %c0_i32, %c0_i32_0 : i32, i32
  }
  func.func @transform_2(%arg0: i32) -> (i32, i32) {
    %c0_i32 = arith.constant 0 : i32
    %c0_i32_0 = arith.constant 0 : i32
    %c0_i32_1 = arith.constant 0 : i32
    return %c0_i32, %c0_i32_0 : i32, i32
  }
  func.func @transform_3(%arg0: i32) -> (i32, i32) {
    %c0_i32 = arith.constant 0 : i32
    %c0_i32_0 = arith.constant 0 : i32
    %c0_i32_1 = arith.constant 0 : i32
    return %c0_i32, %c0_i32_0 : i32, i32
  }
  func.func @transform_4(%arg0: i32) -> (i32, i32) {
    %c0_i32 = arith.constant 0 : i32
    %c0_i32_0 = arith.constant 0 : i32
    %c0_i32_1 = arith.constant 0 : i32
    return %c0_i32, %c0_i32_0 : i32, i32
  }
  func.func @transform_5(%arg0: i32) -> (i32, i32) {
    %c0_i32 = arith.constant 0 : i32
    %c0_i32_0 = arith.constant 0 : i32
    return %arg0, %c0_i32 : i32, i32
  }
}

</mosaic_0001>

<bundles_post_ra>
// kernel: tpu_custom_call.1
= control target key start
LH: loop header
LB: loop body
LE: loop exit
PB: predicated region body
PF: predicated region fallthrough
CT: control target
= control target key end

     0   :  { %10 = vsyncpa [#allocation3], 0  ;;  %s1035_s0 = inlined_call_operand.hbm [shape: bf16[128,128], index: 0, kind: input, shape index: {}]   ;;  %s1036_s1 = inlined_call_operand.hbm [shape: bf16[128,128], index: 1, kind: input, shape index: {}]   ;;  %s1037_s2 = inlined_call_operand.vmem [shape: f32[1,128], index: 2, kind: input, shape index: {}]   ;;  %s1038_s3 = inlined_call_operand.hbm [shape: bf16[128,128], index: 3, kind: input, shape index: {}]   ;;  %s1039_s4 = inlined_call_operand.vmem [shape: f32[1,128], index: 4, kind: input, shape index: {}]   ;;  %s1040_s5 = inlined_call_operand.hbm [shape: bf16[128,128], index: 5, kind: output, shape index: {}]  }
   0x1   :  { %11 = vsyncpa [#allocation6], 0 }
   0x2   :  { %12 = vsyncpa [#allocation4], 0  ;;  %s926_s18 = smov [#allocation5]   ;;  %s927_s20 = smov [#allocation2]  }
   0x3   :  { %s30_s19 = sshll.u32 %s926_s18, 4  ;;  %s18_s21 = sshll.u32 %s927_s20, 4  ;;  %s31_s19 = int_to_ptr.vmem [resolvable:$true] %s30_s19  ;;  %s962_s21 = int_to_ptr.vmem [resolvable:$true] %s18_s21 }
   0x4   :  { %s832_s24 = scalar_lea.hbm %s1036_s1, 1024 }
   0x5   :  { %p833_p0 = scmp.ne.s32.totalorder %s1036_s1, %s832_s24  ;;  %p836_p1 = scmp.lt.u32.totalorder %s832_s24, %s1036_s1 }
   0x7   :  { %p838_p2 = pnand %p836_p1, %p833_p0 }
   0x9   :  { %841 = shalt.err (!%p838_p2)
}
   0xa   :  { %s842_s29 = scalar_lea.vmem %s31_s19, 1024  ;;  %p847_p4 = scmp.lt.s32.totalorder %s31_s19, %s31_s19 }
   0xb   :  { %p843_p3 = scmp.ne.s32.totalorder %s31_s19, %s842_s29  ;;  %p848_p5 = scmp.lt.s32.totalorder %s842_s29, %s842_s29 }
   0xd   :  { %p849_p6 = por %p848_p5, %p847_p4 }
   0xf   :  { %p850_p7 = pnand %p849_p6, %p843_p3 }
  0x11   :  { %853 = shalt.err (!%p850_p7)
}
  0x12   :  { %s928_s30 = smov 64   ;;  %s929_s6 = smov 4  }
  0x13   :  { %36 = dma.hbm_to_vmem [thread:$0]  %s1036_s1, 1024, %s31_s19, [#allocation6], %s928_s30, %s928_s30, %s929_s6  }
  0x14   :  { %s854_s11 = scalar_lea.hbm %s1035_s0, 1024 }
  0x15   :  { %p855_p8 = scmp.ne.s32.totalorder %s1035_s0, %s854_s11  ;;  %p858_p9 = scmp.lt.u32.totalorder %s854_s11, %s1035_s0 }
  0x17   :  { %p860_p10 = pnand %p858_p9, %p855_p8 }
  0x19   :  { %863 = shalt.err (!%p860_p10)
}
  0x1a   :  { %s864_s16 = scalar_lea.vmem %s962_s21, 1024  ;;  %p869_p12 = scmp.lt.s32.totalorder %s962_s21, %s962_s21 }
  0x1b   :  { %p865_p11 = scmp.ne.s32.totalorder %s962_s21, %s864_s16  ;;  %p870_p13 = scmp.lt.s32.totalorder %s864_s16, %s864_s16 }
  0x1d   :  { %p871_p0 = por %p870_p13, %p869_p12 }
  0x1f   :  { %p872_p1 = pnand %p871_p0, %p865_p11 }
  0x21   :  { %875 = shalt.err (!%p872_p1)
}
  0x22   :  { %24 = dma.hbm_to_vmem [thread:$0]  %s1035_s0, 1024, %s962_s21, [#allocation3], %s928_s30, %s928_s30, %s929_s6  }
  0x23   :  { %s930_s18 = smov [#allocation7]   ;;  %s876_s23 = scalar_lea.hbm %s1038_s3, 1024 }
  0x24   :  { %s44_s19 = sshll.u32 %s930_s18, 4  ;;  %p877_p2 = scmp.ne.s32.totalorder %s1038_s3, %s876_s23  ;;  %s45_s19 = int_to_ptr.vmem [resolvable:$true] %s44_s19 }
  0x25   :  { %p880_p3 = scmp.lt.u32.totalorder %s876_s23, %s1038_s3 }
  0x27   :  { %p882_p4 = pnand %p880_p3, %p877_p2 }
  0x29   :  { %885 = shalt.err (!%p882_p4)
}
  0x2a   :  { %s886_s28 = scalar_lea.vmem %s45_s19, 1024  ;;  %p891_p6 = scmp.lt.s32.totalorder %s45_s19, %s45_s19 }
  0x2b   :  { %p887_p5 = scmp.ne.s32.totalorder %s45_s19, %s886_s28  ;;  %p892_p7 = scmp.lt.s32.totalorder %s886_s28, %s886_s28 }
  0x2d   :  { %p893_p8 = por %p892_p7, %p891_p6 }
  0x2f   :  { %p894_p9 = pnand %p893_p8, %p887_p5 }
  0x31   :  { %897 = shalt.err (!%p894_p9)
}
  0x32   :  { %50 = dma.hbm_to_vmem [thread:$0]  %s1038_s3, 1024, %s45_s19, [#allocation6], %s928_s30, %s928_s30, %s929_s6  }
  0x33   :  { %920 = dma.done.wait [#allocation3], 1024  }
  0x34   :  { %921 = vsyncadd [#allocation3], 4294966272 }
  0x35   :  { %922 = dma.done.wait [#allocation6], 2048  }
  0x36   :  { %923 = vsyncadd [#allocation6], 4294965248  ;;  %v808_v0 = vld [vmem:[#allocation5] sm:$0xff]   ;;  %v809_v1 = vld [vmem:[#allocation5 + $0x8] sm:$0xff]  }
  0x37   :  { %738 = vmatprep.subr.bf16.mxu0 %v808_v0  ;;  %v810_v2 = vld [vmem:[#allocation5 + $0x10] sm:$0xff]   ;;  %v811_v3 = vld [vmem:[#allocation5 + $0x18] sm:$0xff]   ;;  %v816_v4 = vld [vmem:[#allocation2] sm:$0xff]  }
  0x38   :  { %739 = vmatpush3.bf16.msra.mxu0 %v808_v0  ;;  %754 = vmatprep.mubr.bf16.mxu0 %v816_v4  ;;  %v812_v5 = vld [vmem:[#allocation5 + $0x20] sm:$0xff]   ;;  %v813_v6 = vld [vmem:[#allocation5 + $0x28] sm:$0xff]   ;;  %v814_v9 = vld [vmem:[#allocation5 + $0x30] sm:$0xff]  }
  0x39   :  { %740 = vmatprep.subr.bf16.mxu0 %v809_v1  ;;  %v824_v7 = vld [vmem:[#allocation7] sm:$0xff]   ;;  %v825_v8 = vld [vmem:[#allocation7 + $0x8] sm:$0xff]   ;;  %v826_v10 = vld [vmem:[#allocation7 + $0x10] sm:$0xff]  }
  0x3a   :  { %770 = vmatprep.subr.bf16.mxu1 %v824_v7  ;;  %v815_v11 = vld [vmem:[#allocation5 + $0x38] sm:$0xff]   ;;  %v828_v13 = vld [vmem:[#allocation7 + $0x20] sm:$0xff]   ;;  %v817_v14 = vld [vmem:[#allocation2 + $0x8] sm:$0xff]  }
  0x3b   :  { %771 = vmatpush3.bf16.msra.mxu1 %v824_v7  ;;  %v827_v12 = vld [vmem:[#allocation7 + $0x18] sm:$0xff]   ;;  %v818_v15 = vld [vmem:[#allocation2 + $0x10] sm:$0xff]   ;;  %v829_v16 = vld [vmem:[#allocation7 + $0x28] sm:$0xff]  }
  0x3c   :  { %741 = vmatpush3.bf16.msra.mxu0 %v809_v1  ;;  %772 = vmatprep.subr.bf16.mxu1 %v825_v8  ;;  %v819_v17 = vld [vmem:[#allocation2 + $0x18] sm:$0xff]   ;;  %v820_v18 = vld [vmem:[#allocation2 + $0x20] sm:$0xff]   ;;  %v821_v19 = vld [vmem:[#allocation2 + $0x28] sm:$0xff]  }
  0x3d   :  { %742 = vmatprep.subr.bf16.mxu0 %v810_v2  ;;  %v822_v20 = vld [vmem:[#allocation2 + $0x30] sm:$0xff]   ;;  %v823_v21 = vld [vmem:[#allocation2 + $0x38] sm:$0xff]   ;;  %v601_v24 = vld [vmem:[%s1037_s2] ss:$0 sm:$0xff] }
  0x3e   :  { %v830_v22 = vld [vmem:[#allocation7 + $0x30] sm:$0xff]   ;;  %v831_v23 = vld [vmem:[#allocation7 + $0x38] sm:$0xff]  }
  0x3f   :  { %773 = vmatpush3.bf16.msra.mxu1 %v825_v8 }
  0x40   :  { %743 = vmatpush3.bf16.msra.mxu0 %v810_v2  ;;  %774 = vmatprep.subr.bf16.mxu1 %v826_v10 }
  0x41   :  { %744 = vmatprep.subr.bf16.mxu0 %v811_v3 }
  0x43   :  { %775 = vmatpush3.bf16.msra.mxu1 %v826_v10 }
  0x44   :  { %745 = vmatpush3.bf16.msra.mxu0 %v811_v3  ;;  %776 = vmatprep.subr.bf16.mxu1 %v827_v12 }
  0x45   :  { %746 = vmatprep.subr.bf16.mxu0 %v812_v5 }
  0x47   :  { %777 = vmatpush3.bf16.msra.mxu1 %v827_v12 }
  0x48   :  { %747 = vmatpush3.bf16.msra.mxu0 %v812_v5  ;;  %778 = vmatprep.subr.bf16.mxu1 %v828_v13 }
  0x49   :  { %748 = vmatprep.subr.bf16.mxu0 %v813_v6 }
  0x4b   :  { %779 = vmatpush3.bf16.msra.mxu1 %v828_v13 }
  0x4c   :  { %749 = vmatpush3.bf16.msra.mxu0 %v813_v6  ;;  %780 = vmatprep.subr.bf16.mxu1 %v829_v16 }
  0x4d   :  { %750 = vmatprep.subr.bf16.mxu0 %v814_v9 }
  0x4f   :  { %781 = vmatpush3.bf16.msra.mxu1 %v829_v16 }
  0x50   :  { %751 = vmatpush3.bf16.msra.mxu0 %v814_v9  ;;  %782 = vmatprep.subr.bf16.mxu1 %v830_v22 }
  0x51   :  { %752 = vmatprep.subr.bf16.mxu0 %v815_v11 }
  0x53   :  { %783 = vmatpush3.bf16.msra.mxu1 %v830_v22 }
  0x54   :  { %753 = vmatpush3.bf16.msra.mxu0 %v815_v11  ;;  %784 = vmatprep.subr.bf16.mxu1 %v831_v23 }
  0x57   :  { %755 = vmatmul.mubr.bf16.vlgmr.msra.gmra.mrb[0].mxu0 %v817_v14  ;;  %785 = vmatpush3.bf16.msra.mxu1 %v831_v23 }
  0x58   :  { %758 = vmatprep.mubr.bf16.mxu0 %v818_v15 }
  0x5f   :  { %759 = vmatmul.mubr.bf16.gmra.mrb[4].mxu0 %v819_v17  ;;  %v618_v17 = vld [vmem:[%s1039_s4] ss:$0 sm:$0xff]  ;;  %s931_s4 = smov [#allocation8]  }
  0x60   :  { %762 = vmatprep.mubr.bf16.mxu0 %v820_v18  ;;  %s588_s8 = sshll.u32 %s931_s4, 4  ;;  %s589_s8 = int_to_ptr.vmem [resolvable:$true] %s588_s8 }
  0x61   :  { %s898_s9 = scalar_lea.vmem %s589_s8, 1024  ;;  %p903_p11 = scmp.lt.s32.totalorder %s589_s8, %s589_s8 }
  0x62   :  { %p899_p10 = scmp.ne.s32.totalorder %s589_s8, %s898_s9  ;;  %p904_p12 = scmp.lt.s32.totalorder %s898_s9, %s898_s9 }
  0x64   :  { %p905_p13 = por %p904_p12, %p903_p11 }
  0x66   :  { %p906_p0 = pnand %p905_p13, %p899_p10 }
  0x67   :  { %763 = vmatmul.mubr.bf16.gmra.mrb[8].mxu0 %v821_v19 }
  0x68   :  { %766 = vmatprep.mubr.bf16.mxu0 %v822_v20 }
  0x6f   :  { %767 = vmatmul.mubr.bf16.gmra.mrb[12].mxu0 %v823_v21 }
 0x12a   :  { %v756_v25 = vpop.f32.mrb[0].mxu0 }
 0x12b   :  { %v241_v26 = vadd.f32 %v756_v25, %v601_v24  ;;  %v232_v27 = vpop.f32.mrb[1].mxu0 }
 0x12c   :  { %v233_v28 = vadd.f32 %v601_v24, %v232_v27  ;;  %v757_v29 = vpop.f32.mrb[2].mxu0 }
 0x12d   :  { %v244_v30 = vadd.f32 %v757_v29, %v601_v24  ;;  %v235_v31 = vpop.f32.mrb[3].mxu0  ;;  %v297_v33 = vmax.f32 %v241_v26, 0.0 }
 0x12e   :  { %v236_v32 = vadd.f32 %v601_v24, %v235_v31  ;;  %v295_v35 = vmax.f32 %v233_v28, 0.0 }
 0x12f   :  { %v298_v34 = vmax.f32 %v244_v30, 0.0 }
 0x130   :  { %v296_v36 = vmax.f32 %v236_v32, 0.0 }
 0x131   :  { %v312_v37 = vpack.c.bf16 %v298_v34, %v297_v33 }
 0x132   :  { %v760_v38 = vpop.f32.mrb[4].mxu0  ;;  %v311_v39 = vpack.c.bf16 %v296_v36, %v295_v35 }
 0x133   :  { %v257_v40 = vadd.f32 %v760_v38, %v601_v24  ;;  %v248_v41 = vpop.f32.mrb[5].mxu0 }
 0x134   :  { %v249_v42 = vadd.f32 %v601_v24, %v248_v41  ;;  %v761_v43 = vpop.f32.mrb[6].mxu0  ;;  %786 = vmatprep.mubr.bf16.mxu1 %v311_v39 }
 0x135   :  { %v260_v44 = vadd.f32 %v761_v43, %v601_v24  ;;  %v251_v45 = vpop.f32.mrb[7].mxu0  ;;  %787 = vmatmul.mubr.bf16.vlgmr.msra.gmra.mrb[0].mxu1 %v312_v37  ;;  %v301_v47 = vmax.f32 %v257_v40, 0.0 }
 0x136   :  { %v252_v46 = vadd.f32 %v601_v24, %v251_v45  ;;  %v299_v49 = vmax.f32 %v249_v42, 0.0 }
 0x137   :  { %v302_v48 = vmax.f32 %v260_v44, 0.0 }
 0x138   :  { %v300_v50 = vmax.f32 %v252_v46, 0.0 }
 0x139   :  { %v314_v51 = vpack.c.bf16 %v302_v48, %v301_v47 }
 0x13a   :  { %v313_v52 = vpack.c.bf16 %v300_v50, %v299_v49  ;;  %v764_v53 = vpop.f32.mrb[8].mxu0 }
 0x13b   :  { %v273_v54 = vadd.f32 %v764_v53, %v601_v24  ;;  %v264_v55 = vpop.f32.mrb[9].mxu0 }
 0x13c   :  { %v265_v56 = vadd.f32 %v601_v24, %v264_v55  ;;  %v765_v57 = vpop.f32.mrb[10].mxu0  ;;  %790 = vmatprep.mubr.bf16.mxu1 %v313_v52 }
 0x13d   :  { %v276_v58 = vadd.f32 %v765_v57, %v601_v24  ;;  %v267_v59 = vpop.f32.mrb[11].mxu0  ;;  %791 = vmatmul.mubr.bf16.gmra.mrb[4].mxu1 %v314_v51  ;;  %v305_v61 = vmax.f32 %v273_v54, 0.0 }
 0x13e   :  { %v268_v60 = vadd.f32 %v601_v24, %v267_v59  ;;  %v303_v63 = vmax.f32 %v265_v56, 0.0 }
 0x13f   :  { %v306_v62 = vmax.f32 %v276_v58, 0.0 }
 0x140   :  { %v304_v0 = vmax.f32 %v268_v60, 0.0 }
 0x141   :  { %v316_v1 = vpack.c.bf16 %v306_v62, %v305_v61 }
 0x142   :  { %v315_v2 = vpack.c.bf16 %v304_v0, %v303_v63  ;;  %v768_v3 = vpop.f32.mrb[12].mxu0 }
 0x143   :  { %v289_v4 = vadd.f32 %v768_v3, %v601_v24  ;;  %v280_v5 = vpop.f32.mrb[13].mxu0 }
 0x144   :  { %v281_v6 = vadd.f32 %v601_v24, %v280_v5  ;;  %v769_v7 = vpop.f32.mrb[14].mxu0  ;;  %794 = vmatprep.mubr.bf16.mxu1 %v315_v2 }
 0x145   :  { %v292_v8 = vadd.f32 %v769_v7, %v601_v24  ;;  %v283_v9 = vpop.f32.mrb[15].mxu0  ;;  %795 = vmatmul.mubr.bf16.gmra.mrb[8].mxu1 %v316_v1  ;;  %v309_v11 = vmax.f32 %v289_v4, 0.0 }
 0x146   :  { %v284_v10 = vadd.f32 %v601_v24, %v283_v9  ;;  %v307_v13 = vmax.f32 %v281_v6, 0.0 }
 0x147   :  { %v310_v12 = vmax.f32 %v292_v8, 0.0 }
 0x148   :  { %v308_v14 = vmax.f32 %v284_v10, 0.0 }
 0x149   :  { %v318_v15 = vpack.c.bf16 %v310_v12, %v309_v11 }
 0x14a   :  { %v317_v16 = vpack.c.bf16 %v308_v14, %v307_v13 }
 0x14c   :  { %798 = vmatprep.mubr.bf16.mxu1 %v317_v16 }
 0x14d   :  { %799 = vmatmul.mubr.bf16.gmra.mrb[12].mxu1 %v318_v15 }
 0x208   :  { %v788_v18 = vpop.f32.mrb[0].mxu1 }
 0x209   :  { %v433_v19 = vadd.f32 %v788_v18, %v618_v17  ;;  %v424_v20 = vpop.f32.mrb[1].mxu1 }
 0x20a   :  { %v425_v21 = vadd.f32 %v618_v17, %v424_v20  ;;  %v789_v22 = vpop.f32.mrb[2].mxu1 }
 0x20b   :  { %v436_v23 = vadd.f32 %v789_v22, %v618_v17  ;;  %v427_v25 = vpop.f32.mrb[3].mxu1  ;;  %v489_v26 = vmax.f32 %v433_v19, 0.0 }
 0x20c   :  { %v428_v24 = vadd.f32 %v618_v17, %v427_v25  ;;  %v487_v28 = vmax.f32 %v425_v21, 0.0 }
 0x20d   :  { %v490_v27 = vmax.f32 %v436_v23, 0.0 }
 0x20e   :  { %v488_v29 = vmax.f32 %v428_v24, 0.0 }
 0x20f   :  { %v667_v30 = vpack.c.bf16 %v490_v27, %v489_v26 }
 0x210   :  { %v662_v31 = vpack.c.bf16 %v488_v29, %v487_v28  ;;  %v792_v32 = vpop.f32.mrb[4].mxu1 }
 0x211   :  { %699 = vst [vmem:[#allocation8 + $0x8] sm:$0xff] %v667_v30   ;;  %v449_v33 = vadd.f32 %v792_v32, %v618_v17  ;;  %v440_v34 = vpop.f32.mrb[5].mxu1 }
 0x212   :  { %663 = vst [vmem:[#allocation8] sm:$0xff] %v662_v31   ;;  %v441_v35 = vadd.f32 %v618_v17, %v440_v34  ;;  %v793_v36 = vpop.f32.mrb[6].mxu1 }
 0x213   :  { %v452_v37 = vadd.f32 %v793_v36, %v618_v17  ;;  %v443_v38 = vpop.f32.mrb[7].mxu1  ;;  %v493_v40 = vmax.f32 %v449_v33, 0.0 }
 0x214   :  { %v444_v39 = vadd.f32 %v618_v17, %v443_v38  ;;  %v491_v42 = vmax.f32 %v441_v35, 0.0 }
 0x215   :  { %v494_v41 = vmax.f32 %v452_v37, 0.0 }
 0x216   :  { %v492_v43 = vmax.f32 %v444_v39, 0.0 }
 0x217   :  { %v677_v44 = vpack.c.bf16 %v494_v41, %v493_v40 }
 0x218   :  { %v672_v45 = vpack.c.bf16 %v492_v43, %v491_v42  ;;  %v796_v46 = vpop.f32.mrb[8].mxu1 }
 0x219   :  { %701 = vst [vmem:[#allocation8 + $0x18] sm:$0xff] %v677_v44   ;;  %v465_v47 = vadd.f32 %v796_v46, %v618_v17  ;;  %v456_v48 = vpop.f32.mrb[9].mxu1 }
 0x21a   :  { %700 = vst [vmem:[#allocation8 + $0x10] sm:$0xff] %v672_v45   ;;  %v457_v49 = vadd.f32 %v618_v17, %v456_v48  ;;  %v797_v50 = vpop.f32.mrb[10].mxu1 }
 0x21b   :  { %v468_v51 = vadd.f32 %v797_v50, %v618_v17  ;;  %v459_v52 = vpop.f32.mrb[11].mxu1  ;;  %v497_v54 = vmax.f32 %v465_v47, 0.0 }
 0x21c   :  { %v460_v53 = vadd.f32 %v618_v17, %v459_v52  ;;  %v495_v56 = vmax.f32 %v457_v49, 0.0 }
 0x21d   :  { %v498_v55 = vmax.f32 %v468_v51, 0.0 }
 0x21e   :  { %v496_v57 = vmax.f32 %v460_v53, 0.0 }
 0x21f   :  { %v687_v58 = vpack.c.bf16 %v498_v55, %v497_v54 }
 0x220   :  { %v682_v59 = vpack.c.bf16 %v496_v57, %v495_v56  ;;  %v800_v60 = vpop.f32.mrb[12].mxu1 }
 0x221   :  { %703 = vst [vmem:[#allocation8 + $0x28] sm:$0xff] %v687_v58   ;;  %v481_v61 = vadd.f32 %v800_v60, %v618_v17  ;;  %v472_v62 = vpop.f32.mrb[13].mxu1 }
 0x222   :  { %702 = vst [vmem:[#allocation8 + $0x20] sm:$0xff] %v682_v59   ;;  %v473_v63 = vadd.f32 %v618_v17, %v472_v62  ;;  %v801_v0 = vpop.f32.mrb[14].mxu1 }
 0x223   :  { %v484_v1 = vadd.f32 %v801_v0, %v618_v17  ;;  %v475_v2 = vpop.f32.mrb[15].mxu1  ;;  %v501_v4 = vmax.f32 %v481_v61, 0.0 }
 0x224   :  { %v476_v3 = vadd.f32 %v618_v17, %v475_v2  ;;  %v499_v6 = vmax.f32 %v473_v63, 0.0 }
 0x225   :  { %v502_v5 = vmax.f32 %v484_v1, 0.0 }
 0x226   :  { %v500_v7 = vmax.f32 %v476_v3, 0.0 }
 0x227   :  { %v697_v8 = vpack.c.bf16 %v502_v5, %v501_v4 }
 0x228   :  { %v692_v9 = vpack.c.bf16 %v500_v7, %v499_v6 }
 0x229   :  { %705 = vst [vmem:[#allocation8 + $0x38] sm:$0xff] %v697_v8  }
 0x22a   :  { %704 = vst [vmem:[#allocation8 + $0x30] sm:$0xff] %v692_v9  }
 0x22b   :  { %909 = shalt.err (!%p906_p0)
}
 0x22c   :  { %s910_s12 = scalar_lea.hbm %s1040_s5, 1024 }
 0x22d   :  { %p911_p1 = scmp.ne.s32.totalorder %s1040_s5, %s910_s12  ;;  %p914_p2 = scmp.lt.u32.totalorder %s910_s12, %s1040_s5 }
 0x22f   :  { %p916_p3 = pnand %p914_p2, %p911_p1 }
 0x231   :  { %919 = shalt.err (!%p916_p3)
}
 0x232   :  { %594 = dma.vmem_to_hbm [thread:$0]  %s589_s8, 1024, %s1040_s5, [#allocation4], %s928_s30, %s928_s30, %s929_s6  }
 0x233   :  { %924 = dma.done.wait [#allocation4], 1024  }
 0x234   :  { %925 = vsyncadd [#allocation4], 4294966272 }
 0x235   :  { %598 = vsyncpa [#allocation3], 1 }
 0x236   :  { %599 = vsyncpa [#allocation6], 1 }
 0x237   :  { %600 = vsyncpa [#allocation4], 1 }

</bundles_post_ra>
